<compile_context>
chip_gen: v7x
topology: tpu7x:2x2x1
jax: 0.10.0
libtpu: 0.0.40
codegen_flags: <defaults>
</compile_context>

<pallas_src>
import jax
import jax.numpy as jnp
from jax.experimental import pallas as pl
from jax.experimental.pallas import tpu as pltpu

EPS = 1e-10


def l2norm_kernel(x_ref, w_ref, o_ref):
    # x_ref: (Bn, C, t_hw) activation block; w_ref: (1, C, 1) per-channel weight.
    x = x_ref[...].astype(jnp.float32)
    ss = jnp.sum(x * x, axis=1, keepdims=True)            # (Bn, 1, t_hw): reduce over C
    norm = jnp.sqrt(ss) + EPS                              # eps added after sqrt (torch)
    inv = pl.reciprocal(norm, approx=False)                # one recip per spatial elem
    out = (x * inv) * w_ref[...].astype(jnp.float32)       # sublane + lane broadcasts
    o_ref[...] = out.astype(o_ref.dtype)


def _vmem_limit_bytes():
    """Scoped-VMEM limit: generous but safely below physical capacity."""
    cap = 128 * 1024 * 1024
    try:
        cap = int(pltpu.get_tpu_info().vmem_capacity_bytes)
    except Exception:
        pass
    # v7x (64 MiB phys) -> 48 MiB; v5e/v6e (128 MiB phys) -> 64 MiB.
    return int(min(64 * 1024 * 1024, max(32 * 1024 * 1024, cap * 3 // 4)))


def _plan(N, C, HW, itemsize, vmem_limit):
    """Pick (Bn, grid_n, t_hw, n_hw) for the (N, C, HW) streaming problem."""
    packing = max(1, 4 // itemsize)              # f32 -> 8 sublanes, bf16 -> 16
    sub = 8 * packing
    c_pad = pl.cdiv(C, sub) * sub                # sublane-padded channel count

    row_bytes = C * itemsize                     # real HBM bytes / spatial elem / image
    inflation = c_pad / C                        # VMEM inflation from sublane padding

    # Target ~4 MiB of *real* data per block, capped so the double-buffered
    # in+out pipeline (4 block-sized, sublane-padded VMEM buffers) stays
    # within ~60% of the scoped VMEM limit.
    target_real = 4 * 1024 * 1024
    max_block_real = int((vmem_limit * 0.6) / (4.0 * inflation))
    target_real = max(128 * row_bytes, min(target_real, max_block_real))

    # --- spatial tiling: lane axis, multiples of 128 (or the full extent) ---
    if HW * row_bytes <= target_real:
        t_hw = HW                                # full-extent block: always legal
    else:
        t_max = max(128, (target_real // row_bytes) // 128 * 128)
        n_hw = pl.cdiv(HW, t_max)
        # Near-equal 128-multiple tiles minimize wasted lanes in the ragged tail.
        t_hw = pl.cdiv(pl.cdiv(HW, n_hw), 128) * 128
    n_hw = pl.cdiv(HW, t_hw)

    # --- batch blocking: for tiny C a single image per step moves too little ---
    bn = 1
    if n_hw == 1:
        want = max(1, target_real // max(1, HW * row_bytes))
        for d in range(min(N, int(want)), 0, -1):    # keep blocks dividing N exactly
            if N % d == 0:
                bn = d
                break
    grid_n = pl.cdiv(N, bn)

    # v7x has 2 TensorCores, each with its own HBM path: make sure there are
    # at least 2 grid steps along a "parallel" axis whenever possible.
    if grid_n * n_hw < 2:
        if N >= 2:
            bn = max(1, N // 2)
            while N % bn:
                bn -= 1
            grid_n = N // bn
        elif t_hw == HW and HW >= 256:
            t_hw = pl.cdiv(pl.cdiv(HW, 2), 128) * 128
            n_hw = pl.cdiv(HW, t_hw)

    return bn, grid_n, t_hw, n_hw


def l2norm(x_nchw: jax.Array, weight: jax.Array) -> jax.Array:
    """x_nchw: (N, C, H, W); weight: (C,). Returns (N, C, H, W)."""
    N, C, H, W = x_nchw.shape
    HW = H * W
    x3 = x_nchw.reshape(N, C, HW)                # free reshape: no transpose, no copy
    w3 = weight.reshape(1, C, 1)

    itemsize = jnp.dtype(x_nchw.dtype).itemsize
    vmem_limit = _vmem_limit_bytes()
    bn, grid_n, t_hw, n_hw = _plan(N, C, HW, itemsize, vmem_limit)

    out3 = pl.pallas_call(
        l2norm_kernel,
        out_shape=jax.ShapeDtypeStruct((N, C, HW), x_nchw.dtype),
        grid_spec=pltpu.PrefetchScalarGridSpec(
            num_scalar_prefetch=0,
            grid=(grid_n, n_hw),
            in_specs=[
                pl.BlockSpec((bn, C, t_hw), lambda n, s: (n, 0, s)),
                pl.BlockSpec((1, C, 1), lambda n, s: (0, 0, 0)),   # weight stays resident
            ],
            out_specs=pl.BlockSpec((bn, C, t_hw), lambda n, s: (n, 0, s)),
        ),
        compiler_params=pltpu.CompilerParams(
            dimension_semantics=("parallel", "parallel"),
            vmem_limit_bytes=vmem_limit,
        ),
    )(x3, w3)

    return out3.reshape(N, C, H, W)


def _reference(x, weight):
    norm = jnp.sqrt(jnp.sum(x * x, axis=1, keepdims=True)) + EPS
    return weight[None, :, None, None] * (x / norm)


if __name__ == "__main__":
    # Module config: n_channels=4, scale (gamma)=20.0 -> weight init to constant 20.0
    n_channels = 4
    gamma = 20.0
    weight = jnp.full((n_channels,), gamma, dtype=jnp.float32)

    key = jax.random.PRNGKey(0)
    x = jax.random.normal(key, (2, n_channels, 16, 16), dtype=jnp.float32)  # NCHW

    out = jax.block_until_ready(l2norm(x, weight))
    ref = _reference(x, weight)
    assert out.shape == x.shape
    assert jnp.allclose(out, ref, atol=1e-5, rtol=1e-5)

    # Odd (non-128-multiple) spatial shape: full-extent last-dim block path.
    x2 = jax.random.normal(jax.random.PRNGKey(1), (3, n_channels, 5, 7), dtype=jnp.float32)
    out2 = jax.block_until_ready(l2norm(x2, weight))
    assert jnp.allclose(out2, _reference(x2, weight), atol=1e-5, rtol=1e-5)

    # N == 1: exercises the forced >=2-step spatial split and the in-kernel
    # ragged tail (two 256-wide tiles over HW=400, no wrapper pad/slice).
    x3 = jax.random.normal(jax.random.PRNGKey(2), (1, n_channels, 20, 20), dtype=jnp.float32)
    out3 = jax.block_until_ready(l2norm(x3, weight))
    assert jnp.allclose(out3, _reference(x3, weight), atol=1e-5, rtol=1e-5)

    print("KERNEL_OK")
</pallas_src>

<mosaic_0001>
module attributes {stable_mosaic.version = 11 : i64} {
  func.func @l2norm_kernel(%arg0: i32, %arg1: i32, %arg2: memref<1x4x256xf32, #tpu.memory_space<vmem>>, %arg3: memref<1x4x1xf32, #tpu.memory_space<vmem>>, %arg4: memref<1x4x256xf32, #tpu.memory_space<vmem>>) attributes {dimension_semantics = [#tpu.dimension_semantics<parallel>, #tpu.dimension_semantics<parallel>], iteration_bounds = array<i64: 2, 1>, scalar_prefetch = 0 : i64, scratch_operands = 0 : i64, tpu.core_type = #tpu.core_type<tc>, window_params = [{transform_indices = @transform_0, window_bounds = array<i64: 1, 4, 256>}, {pipeline_mode = #tpu.pipeline_mode<synchronous>, transform_indices = @transform_1, window_bounds = array<i64: 1, 4, 1>}, {transform_indices = @transform_2, window_bounds = array<i64: 1, 4, 256>}]} {
    %c0 = arith.constant 0 : index
    %c0_0 = arith.constant 0 : index
    %c0_1 = arith.constant 0 : index
    %0 = vector.load %arg2[%c0, %c0_0, %c0_1] : memref<1x4x256xf32, #tpu.memory_space<vmem>>, vector<1x4x256xf32>
    %1 = arith.mulf %0, %0 : vector<1x4x256xf32>
    %cst = arith.constant dense<0.000000e+00> : vector<1x256xf32>
    %2 = vector.multi_reduction <add>, %1, %cst [1] : vector<1x4x256xf32> to vector<1x256xf32>
    %3 = vector.shape_cast %2 : vector<1x256xf32> to vector<1x1x256xf32>
    %4 = math.sqrt %3 : vector<1x1x256xf32>
    %cst_2 = arith.constant 1.000000e-10 : f32
    %5 = vector.broadcast %cst_2 : f32 to vector<1x1x256xf32>
    %6 = arith.addf %4, %5 : vector<1x1x256xf32>
    %7 = tpu.reciprocal %6 : vector<1x1x256xf32> -> vector<1x1x256xf32>
    %8 = vector.broadcast %7 : vector<1x1x256xf32> to vector<1x4x256xf32>
    %9 = arith.mulf %0, %8 : vector<1x4x256xf32>
    %c0_3 = arith.constant 0 : index
    %c0_4 = arith.constant 0 : index
    %c0_5 = arith.constant 0 : index
    %10 = vector.load %arg3[%c0_3, %c0_4, %c0_5] : memref<1x4x1xf32, #tpu.memory_space<vmem>>, vector<1x4x1xf32>
    %11 = vector.broadcast %10 : vector<1x4x1xf32> to vector<1x4x256xf32>
    %12 = arith.mulf %9, %11 : vector<1x4x256xf32>
    %c0_6 = arith.constant 0 : index
    %c0_7 = arith.constant 0 : index
    %c0_8 = arith.constant 0 : index
    %13 = vector.load %arg4[%c0_6, %c0_7, %c0_8] : memref<1x4x256xf32, #tpu.memory_space<vmem>>, vector<1x4x256xf32>
    tpu.vector_store %arg4[%c0_6, %c0_7, %c0_8], %12 {strides = array<i32>} : memref<1x4x256xf32, #tpu.memory_space<vmem>>, vector<1x4x256xf32>,
    return
  }
  func.func @transform_0(%arg0: i32, %arg1: i32) -> (i32, i32, i32) {
    %c0_i32 = arith.constant 0 : i32
    %c0_i32_0 = arith.constant 0 : i32
    return %arg0, %c0_i32, %arg1 : i32, i32, i32
  }
  func.func @transform_1(%arg0: i32, %arg1: i32) -> (i32, i32, i32) {
    %c0_i32 = arith.constant 0 : i32
    %c0_i32_0 = arith.constant 0 : i32
    %c0_i32_1 = arith.constant 0 : i32
    %c0_i32_2 = arith.constant 0 : i32
    return %c0_i32, %c0_i32_0, %c0_i32_1 : i32, i32, i32
  }
  func.func @transform_2(%arg0: i32, %arg1: i32) -> (i32, i32, i32) {
    %c0_i32 = arith.constant 0 : i32
    %c0_i32_0 = arith.constant 0 : i32
    return %arg0, %c0_i32, %arg1 : i32, i32, i32
  }
}

</mosaic_0001>

<bundles_post_ra>
// kernel: tpu_custom_call.1
= control target key start
LH: loop header
LB: loop body
LE: loop exit
PB: predicated region body
PF: predicated region fallthrough
CT: control target
= control target key end

     0   :  { %7 = vsyncpa [#allocation3], 0  ;;  %s851_s0 = inlined_call_operand.hbm [shape: f32[2,4,256], index: 0, kind: input, shape index: {}]   ;;  %s852_s1 = inlined_call_operand.hbm [shape: f32[1,4,1], index: 1, kind: input, shape index: {}]   ;;  %s853_s2 = inlined_call_operand.hbm [shape: f32[2,4,256], index: 2, kind: output, shape index: {}]  }
   0x1   :  { %9 = vsyncpa [#allocation3 + $0x1], 0 }
   0x2   :  { %10 = vsyncpa [#allocation6], 0 }
   0x3   :  { %11 = vsyncpa [#allocation4], 0 }
   0x4   :  { %13 = vsyncpa [#allocation4 + $0x1], 0  ;;  %s631_s9 = smov 0   ;;  %s633_s10 = smov 0  }
   0x5   :  { %s635_s11 = smov 0   ;;  %s637_s12 = smov 0  }
   0x6   :  { %s639_s13 = smov 0   ;;  %s641_s14 = smov 0  }
   0x7 LB: > { %s362_s15 = sadd.s32 4294967295, %s609_s14   ;;  %s363_s16 = sadd.s32 4294967294, %s609_s14   ;;  %s609_s14 = sphi %s641_s14, %s19_s14   ;;  %s605_s13 = sphi %s639_s13, %s878_s13   ;;  %s601_s12 = sphi %s637_s12, %s877_s12   ;;  %s597_s11 = sphi %s635_s11, %s876_s11   ;;  %s593_s10 = sphi %s633_s10, %s875_s10   ;;  %s589_s9 = sphi %s631_s9, %s874_s9  }
   0x8   : > { %p53_p0 = scmp.ne.s32.totalorder %s593_s10, %s589_s9  ;;  %p665_p1 = scmp.eq.s32.totalorder %s362_s15, 0 }
   0x9   : > { %p669_p2 = scmp.eq.s32.totalorder %s362_s15, 1  ;;  %p106_p3 = scmp.eq.s32.totalorder %s363_s16, 1 }
   0xa   : > { %s858_s17 = scalar_select %p665_p1, 1, 0 }
   0xb   : > { %s859_s18 = scalar_select %p669_p2, 1, 0 }
   0xc   : > { %p675_p4 = por %p665_p1, %p53_p0  ;;  %p364_p5 = scmp.ge.s32.totalorder %s609_s14, 1 }
   0xd   : > { %p680_p6 = por %p106_p3, %p53_p0  ;;  %p113_p7 = scmp.lt.s32.totalorder %s609_s14, 3 }
   0xe   : > { %s860_s19 = scalar_select %p675_p4, 1, 0 }
   0xf   : > { %s861_s20 = scalar_select %p680_p6, 1, 0 }
  0x10   : > { %p685_p8 = pnand %p364_p5, %p113_p7  ;;  %s611_s22 = smov [#allocation5]  }
  0x11   : > { %s126_s23 = sshll.u32 %s611_s22, 4  ;;  %s31_s25 = sadd.s32 1, %s605_s13  ;;  %s127_s23 = int_to_ptr.vmem [resolvable:$true] %s126_s23 }
  0x12   : > { %s862_s21 = scalar_select %p685_p8, 1, 0 }
  0x13   : > { %p389_p10 = pneg %p685_p8  ;;  %s40_s26 = sadd.s32 1, %s597_s11 }
  0x14   : > { %p700_p12 = scmp.ge.s32.totalorder %s31_s25, 2  ;;  %s465_s30 = scalar_lea.hbm %s852_s1, 64 }
  0x15   : > { %p694_p11 = pnand %p389_p10, %p665_p1  ;;  %p466_p13 = scmp.ne.s32.totalorder %s852_s1, %s465_s30 }
  0x16   : > { %s864_s27 = scalar_select %p700_p12, 1, 0 }
  0x17   : > { %p467_p0 = pneg %p694_p11  ;;  %p472_p7 = scmp.lt.u32.totalorder %s465_s30, %s852_s1 }
  0x19   : > { %p468_p3 = pnand %p467_p0, %p466_p13 }
  0x1b   : > { %p469_p5 = pneg %p468_p3 }
  0x1d   : > { %p474_p10 = pnand %p472_p7, %p469_p5 }
  0x1f   : > { %477 = shalt.err (!%p474_p10)
}
  0x20   : > { %s478_s7 = scalar_lea.vmem %s127_s23, 64  ;;  %p486_p4 = scmp.lt.s32.totalorder %s127_s23, %s127_s23 }
  0x21   : > { %p479_p9 = scmp.ne.s32.totalorder %s127_s23, %s478_s7  ;;  %p487_p8 = scmp.lt.s32.totalorder %s478_s7, %s478_s7 }
  0x23   : > { %p481_p6 = pnand %p479_p9, %p467_p0  ;;  %p488_p2 = por %p487_p8, %p486_p4 }
  0x25   : > { %p482_p1 = pneg %p481_p6 }
  0x27   : > { %p489_p12 = pnand %p488_p2, %p482_p1 }
  0x29   : > { %492 = shalt.err (!%p489_p12)
}
  0x2a   : > { %392 = dma.hbm_to_vmem [thread:$0]  (!%p694_p11), %s852_s1, 64, %s127_s23, [#allocation6]  }
  0x2b   : > { %p865_p4 = scmp.ne.s32.totalorder %s864_s27, 0  ;;  %p47_p1 = scmp.ne.s32.totalorder %s597_s11, %s593_s10 }
  0x2c   : > { %p48_p2 = scmp.eq.s32.totalorder %s609_s14, 0  ;;  %p402_p6 = scmp.lt.s32.totalorder %s609_s14, 2 }
  0x2d   : > { %s880_s25 = smov (%p865_p4, %s31_s25), 0  ;;  %p866_p12 = scmp.ne.s32.totalorder %s859_s18, 0 }
  0x2e   : > { %s35_s16 = ssub.s32 %s605_s13, %s880_s25  ;;  %p49_p9 = por %p48_p2, %p47_p1 }
  0x2f   : > { %p38_p8 = scmp.eq.s32.totalorder %s35_s16, 0  ;;  %p732_p13 = por %p866_p12, %p47_p1 }
  0x30   : > { %s137_s24 = sand.u32 1, %s597_s11   ;;  %s379_s27 = sshll.u32 %s605_s13, 7 }
  0x31   : > { %s740_s28 = scalar_select %p38_p8, %s597_s11, %s40_s26  }
  0x32   : > { %s367_s23 = sshll.u32 %s137_s24, 3  ;;  %s746_s3 = scalar_lea.hbm %s851_s0, %s379_s27 }
  0x33   : > { %s141_s18 = scalar_lea.vmem [#allocation2], %s367_s23  ;;  %p750_p11 = pnand %p402_p6, %p49_p9 }
  0x34   : > { %s151_s4 = sshll.u32 %s141_s18, 4  ;;  %s138_s26 = scalar_lea.sflag [#allocation3], %s137_s24  ;;  %s748_s4 = int_to_ptr.vmem [resolvable:$true] %s151_s4 }
  0x35   : > { %s493_s6 = scalar_lea.hbm %s746_s3, 128  ;;  %p495_p3 = pneg %p750_p11 }
  0x36   : > { %p494_p0 = scmp.ne.s32.totalorder %s746_s3, %s493_s6  ;;  %s498_s15 = scalar_lea.hbm %s851_s0, 256 }
  0x37   : > { %p499_p10 = scmp.lt.u32.totalorder %s746_s3, %s851_s0  ;;  %p500_p4 = scmp.lt.u32.totalorder %s498_s15, %s493_s6 }
  0x38   : > { %p496_p5 = pnand %p495_p3, %p494_p0  ;;  %p502_p2 = scmp.lt.u32.totalorder %s493_s6, %s746_s3 }
  0x39   : > { %p501_p1 = por %p500_p4, %p499_p10 }
  0x3a   : > { %p497_p7 = pneg %p496_p5 }
  0x3b   : > { %p503_p6 = por %p502_p2, %p501_p1 }
  0x3d   : > { %p504_p8 = pnand %p503_p6, %p497_p7 }
  0x3f   : > { %507 = shalt.err (!%p504_p8)
}
  0x40   : > { %s508_s24 = scalar_lea.vmem %s748_s4, 128  ;;  %s612_s27 = smov [#allocation2]  }
  0x41   : > { %p509_p9 = scmp.ne.s32.totalorder %s748_s4, %s508_s24  ;;  %s513_s29 = sshll.u32 %s612_s27, 4  ;;  %s514_s29 = int_to_ptr.vmem [resolvable:$false] %s513_s29 }
  0x42   : > { %s515_s30 = scalar_lea.vmem %s514_s29, 256  ;;  %p516_p5 = scmp.lt.s32.totalorder %s748_s4, %s514_s29 }
  0x43   : > { %p511_p12 = pnand %p509_p9, %p495_p3  ;;  %p517_p10 = scmp.lt.s32.totalorder %s515_s30, %s508_s24 }
  0x45   : > { %p512_p0 = pneg %p511_p12  ;;  %p518_p4 = por %p517_p10, %p516_p5 }
  0x47   : > { %p519_p1 = pnand %p518_p4, %p512_p0 }
  0x49   : > { %522 = shalt.err (!%p519_p1)
}
  0x4a   : > { %396 = dma.hbm_to_vmem [thread:$0]  (!%p750_p11), %s746_s3, 128, %s748_s4, %s138_s26  }
  0x4b   : > { %p869_p7 = scmp.ne.s32.totalorder %s862_s21, 0 }
  0x4c   : > { %s782_s18 = sand.u32 (!%p869_p7), 1, %s593_s10   ;;  %p870_p3 = scmp.ne.s32.totalorder (!%p869_p7), %s860_s19, 0 }
  0x4d   : > { %160 = sbr.rel (%p869_p7) target bundleno = 236 (0xec), region = 28  ;;  %s371_s6 = sshll.u32 (!%p869_p7), %s782_s18, 3 }
  0x4e   : > { %s163_s7 = scalar_lea.sflag (!%p869_p7), [#allocation3], %s782_s18  ;;  %s166_s8 = scalar_lea.vmem (!%p869_p7), [#allocation2], %s371_s6 }
  0x54   : > { %576 = dma.done.wait (%p870_p3), %s163_s7, 128  }
  0x55   : > { %578 = vsyncadd (%p870_p3), %s163_s7, 4294967168  ;;  %p871_p11 = scmp.ne.s32.totalorder %s858_s17, 0 }
  0x57   : > { %580 = dma.done.wait (%p871_p11), [#allocation6], 64  }
  0x58   : > { %582 = vsyncadd (%p871_p11), [#allocation6], 4294967232  ;;  %v613_v0 = vmov 0   ;;  %v236_v1 = vld [vmem:[#allocation5] sm:$0xf]  ;;  %v193_v2 = vld [vmem:[%s166_s8] sm:$0xff]  ;;  %v244_v33 = vlaneseq }
  0x59   : > { %456 = vset.pattern.permute.xlu0 %v613_v0  ;;  %v194_v3 = vmul.f32 %v193_v2, %v193_v2  ;;  %vm198_vm0 = vcmask 1043456   ;;  %v614_v31 = vmov 839922192   ;;  %s380_s17 = sshll.u32 %s601_s12, 7  ;;  %s190_s19 = scalar_lea.vmem [#allocation7], %s371_s6 }
  0x5a   : > { %239 = vperm.xlu0 %456, %v236_v1   ;;  %v242_v32 = vunpack.c.l.s4 %v614_v31  ;;  %v245_v37 = vshrl.u32 %v244_v33, 7  ;;  %s268_s21 = sshll.u32 %s190_s19, 4  ;;  %s802_s5 = scalar_lea.hbm %s853_s2, %s380_s17  ;;  %s804_s21 = int_to_ptr.vmem [resolvable:$true] %s268_s21 }
  0x5b   : > { %v196_v4 = vcombine.high %v194_v3, %v194_v3  ;;  %v199_v5 = vsel %vm198_vm0, %v194_v3, 0.0  ;;  %s252_s26 = scalar_lea.sflag [#allocation4], %s782_s18  ;;  %s523_s15 = scalar_lea.vmem %s804_s21, 128 }
  0x5c   : > { %v200_v7 = vrot.slane %v199_v5, 4  ;;  %v243_v36 = vunpack.c.0.s8 %v242_v32  ;;  %p524_p2 = scmp.ne.s32.totalorder %s804_s21, %s523_s15  ;;  %s615_s12 = smov [#allocation7]  }
  0x5d   : > { %v206_v6 = vsel %vm198_vm0, %v196_v4, 0.0  ;;  %s527_s16 = sshll.u32 %s615_s12, 4  ;;  %s528_s16 = int_to_ptr.vmem [resolvable:$false] %s527_s16 }
  0x5e   : > { %v207_v8 = vrot.slane %v206_v6, 4  ;;  %v201_v9 = vadd.f32 %v200_v7, %v199_v5  ;;  %v246_v39 = vsub.s32 %v243_v36, %v245_v37  ;;  %p525_p6 = pnand %p524_p2, %p732_p13  ;;  %s529_s23 = scalar_lea.vmem %s528_s16, 256 }
  0x5f   : > { %p530_p9 = scmp.lt.s32.totalorder %s804_s21, %s528_s16  ;;  %p531_p12 = scmp.lt.s32.totalorder %s529_s23, %s523_s15 }
  0x60   : > { %v208_v10 = vadd.f32 %v207_v8, %v206_v6  ;;  %v202_v11 = vrot.slane %v201_v9, 2  ;;  %p526_p8 = pneg %p525_p6 }
  0x61   : > { %p532_p0 = por %p531_p12, %p530_p9 }
  0x62   : > { %v209_v12 = vrot.slane %v208_v10, 2  ;;  %v203_v13 = vadd.f32 %v202_v11, %v201_v9 }
  0x63   : > { %p533_p5 = pnand %p532_p0, %p526_p8 }
  0x64   : > { %v210_v14 = vadd.f32 %v209_v12, %v208_v10  ;;  %v204_v15 = vrot.slane %v203_v13, 1 }
  0x66   : > { %v211_v16 = vrot.slane %v210_v14, 1  ;;  %v205_v17 = vadd.f32 %v204_v15, %v203_v13 }
  0x68   : > { %v212_v18 = vadd.f32 %v211_v16, %v210_v14  ;;  %457 = vrsqrt.f32 %v205_v17  ;;  %vm215_vm1 = vcmp.eq.f32.partialorder %v205_v17, inf  ;;  %v218_v23 = vand.u32 2147483648, %v205_v17 }
  0x69   : > { %vm217_vm3 = vcmp.eq.f32.partialorder %v205_v17, 0.0 }
  0x6a   : > { %459 = vrsqrt.f32 %v212_v18  ;;  %vm222_vm2 = vcmp.eq.f32.partialorder %v212_v18, inf  ;;  %v225_v25 = vand.u32 2147483648, %v212_v18  ;;  %vm224_vm4 = vcmp.eq.f32.partialorder %v212_v18, 0.0 }
  0x72   : > { %v458_v19 = vpop.eup %457 }
  0x73   : > { %v214_v21 = vmul.f32 %v458_v19, %v205_v17 }
  0x74   : > { %v460_v20 = vpop.eup %459 }
  0x75   : > { %v221_v22 = vmul.f32 %v460_v20, %v212_v18  ;;  %v216_v24 = vsel %vm215_vm1, %v205_v17, %v214_v21 }
  0x76   : > { %v219_v27 = vsel %vm217_vm3, %v218_v23, %v216_v24 }
  0x77   : > { %v223_v26 = vsel %vm222_vm2, %v212_v18, %v221_v22  ;;  %v227_v29 = vadd.f32 1e-10, %v219_v27 }
  0x78   : > { %v226_v28 = vsel %vm224_vm4, %v225_v25, %v223_v26 }
  0x79   : > { %v228_v30 = vadd.f32 1e-10, %v226_v28  ;;  %461 = vrcp.f32 %v227_v29 }
  0x7b   : > { %463 = vrcp.f32 %v228_v30 }
  0x83   : > { %v462_v34 = vpop.eup %461 }
  0x85   : > { %v464_v35 = vpop.eup %463 }
  0x86   : > { %v233_v38 = vcombine.low %v462_v34, %v464_v35 }
  0x88   : > { %v235_v40 = vmul.f32 %v233_v38, %v193_v2 }
  0xd9   : > { %v240_v41 = vpop.permute.xlu0 %239 }
  0xda   : > { %v247_v42 = vrot.slane %v240_v41, %v246_v39 }
  0xdc   : > { %v249_v43 = vmul.f32 %v247_v42, %v235_v40 }
  0xde   : > { %250 = vst [vmem:[%s190_s19] sm:$0xff] %v249_v43 }
  0xdf   : > { %536 = shalt.err (!%p533_p5)
}
  0xe0   : > { %s537_s24 = scalar_lea.hbm %s802_s5, 128  ;;  %s541_s30 = scalar_lea.hbm %s853_s2, 256 }
  0xe1   : > { %p538_p10 = scmp.ne.s32.totalorder %s802_s5, %s537_s24  ;;  %p542_p7 = scmp.lt.u32.totalorder %s802_s5, %s853_s2 }
  0xe2   : > { %p543_p3 = scmp.lt.u32.totalorder %s541_s30, %s537_s24  ;;  %p545_p2 = scmp.lt.u32.totalorder %s537_s24, %s802_s5 }
  0xe3   : > { %p539_p4 = pnand %p538_p10, %p732_p13 }
  0xe4   : > { %p544_p11 = por %p543_p3, %p542_p7 }
  0xe5   : > { %p540_p1 = pneg %p539_p4 }
  0xe6   : > { %p546_p6 = por %p545_p2, %p544_p11 }
  0xe8   : > { %p547_p8 = pnand %p546_p6, %p540_p1 }
  0xea   : > { %550 = shalt.err (!%p547_p8)
}
  0xeb   : > { %387 = dma.vmem_to_hbm [thread:$0]  (%p732_p13), %s804_s21, 128, %s802_s5, %s252_s26  }
  0xec PF: > { %s280_s7 = sand.u32 1, %s589_s9   ;;  %p872_p9 = scmp.ne.s32.totalorder %s861_s20, 0 }
  0xed   : > { %p873_p12 = scmp.ge.s32.totalorder %s609_s14, 2  ;;  %s281_s8 = scalar_lea.sflag [#allocation4], %s280_s7 }
  0xef   : > { %p398_p0 = pnand %p873_p12, %p872_p9 }
  0xf1   : > { %584 = dma.done.wait (!%p398_p0), %s281_s8, 128  }
  0xf2   : > { %586 = vsyncadd (!%p398_p0), %s281_s8, 4294967168  ;;  %s19_s14 = sadd.s32 1, %s609_s14   ;;  %s874_s9 = smov %s593_s10 }
  0xf3   : > { %p16_p5 = scmp.ge.s32.totalorder %s19_s14, 4   ;;  %s875_s10 = smov %s597_s11 }
  0xf4   : > { %s876_s11 = smov %s740_s28  ;;  %s877_s12 = smov %s605_s13 }
  0xf5   : > { %s878_s13 = smov %s880_s25  ;;  %18 = sbr.rel (!%p16_p5) target bundleno = 7 (0x7), region = 77 }
  0xfc   :  { %286 = vsyncpa [#allocation3], 1 }
  0xfd   :  { %288 = vsyncpa [#allocation3 + $0x1], 1 }
  0xfe   :  { %289 = vsyncpa [#allocation6], 1 }
  0xff   :  { %290 = vsyncpa [#allocation4], 1 }
 0x100   :  { %292 = vsyncpa [#allocation4 + $0x1], 1 }

</bundles_post_ra>
